<compile_context>
chip_gen: v7x
topology: tpu7x:2x2x1
jax: 0.10.0
libtpu: 0.0.40
codegen_flags: <defaults>
</compile_context>

<pallas_src>
import jax
import jax.numpy as jnp
from jax import lax
from jax.experimental import pallas as pl
from jax.experimental.pallas import tpu as pltpu


def _round_up(x, m):
    return ((x + m - 1) // m) * m


def _cdiv(a, b):
    return (a + b - 1) // b


# Grid-invariant inputs (constant index_map) do not need double buffering.
_RESIDENT = {"pipeline_mode": pl.Buffered(1)} if hasattr(pl, "Buffered") else {}


def _mlp_kernel(x_ref, w1_ref, b1_ref, w2_ref, b2_ref, w3_ref, b3_ref, o_ref):
    # x_ref : (TB, N)    f32          w1_ref: (N, 64N)   bf16   b1_ref: (1, 64N) f32
    # w2_ref: (64N, 32N) bf16         b2_ref: (1, 32N)   f32
    # w3_ref: (1, 32N)   bf16 (row)   b3_ref: (1, 1)     f32
    # o_ref : (1, 1, TB) f32          (lane-dense row of per-row outputs)
    x = x_ref[...].astype(jnp.bfloat16)
    h1 = jnp.dot(x, w1_ref[...], preferred_element_type=jnp.float32)
    h1 = jnp.maximum(h1 + b1_ref[...], 0.0)                         # ReLU, f32
    h2 = jnp.dot(h1.astype(jnp.bfloat16), w2_ref[...],
                 preferred_element_type=jnp.float32)
    h2 = jnp.maximum(h2 + b2_ref[...], 0.0)                         # ReLU, f32
    # Layer 3: contract over H2 against the (1,H2) weight row.  The transposed
    # RHS is folded into the matmul (q.k^T pattern), producing a lane-dense
    # (1, TB) row -> dense vst + dense HBM writeback instead of (TB,1).
    z = lax.dot_general(w3_ref[...], h2.astype(jnp.bfloat16),
                        dimension_numbers=(((1,), (1,)), ((), ())),
                        preferred_element_type=jnp.float32)
    z = z + b3_ref[...]                                             # (1,TB)+(1,1)
    # exp already runs on the EUP; the divide touches a single (1,TB) row.
    o_ref[0] = (1.0 / (1.0 + jnp.exp(-z))).astype(o_ref.dtype)      # Sigmoid


def _choose_tile(B, block_rows):
    # Balanced tiles; at least two grid steps so both v7x TensorCores get work,
    # and padding is bounded by the rounding of one tile, not a whole tile.
    min_tiles = 2 if B > 8 else 1
    n_tiles = max(min_tiles, _cdiv(B, block_rows))
    tb = _cdiv(B, n_tiles)
    return _round_up(tb, 128) if tb >= 128 else _round_up(tb, 8)


def _vmem_limit_bytes(N, H1, H2, TB):
    need = (2 * (N * H1 + H1 * H2 + H2)      # bf16 weights, single-buffered
            + 4 * (H1 + H2 + 1)              # f32 biases
            + 2 * 4 * TB * N                 # x tile, double-buffered
            + 2 * 4 * TB                     # out tile, double-buffered
            + 6 * TB * (H1 + H2))            # h1/h2 f32 + bf16 temporaries
    try:
        cap = int(pltpu.get_tpu_info().vmem_capacity_bytes * 0.85)
    except Exception:
        cap = 56 << 20                       # conservative: under v7x 64 MiB
    return max(min(2 * need + (8 << 20), cap), 32 << 20)


def mlp_forward(x, params, *, block_rows=512):
    """x: (B, N) float32 -> (B, 1) float32; same forward as the torch module."""
    (w1, b1), (w2, b2), (w3, b3) = params
    B, N = x.shape
    H1, H2 = w1.shape[1], w2.shape[1]
    assert w1.shape == (N, H1) and w2.shape == (H1, H2) and w3.shape == (H2, 1)

    TB = _choose_tile(B, block_rows)
    n_tiles = _cdiv(B, TB)
    B_pad = n_tiles * TB
    if B_pad != B:
        x = jnp.pad(x, ((0, B_pad - B), (0, 0)))

    # bf16 matmul operands (kernel accumulates in f32); biases stay f32.
    w1b = w1.astype(jnp.bfloat16)
    w2b = w2.astype(jnp.bfloat16)
    w3row = w3.reshape(1, H2).astype(jnp.bfloat16)   # (1, 32N) row for layer 3

    out = pl.pallas_call(
        _mlp_kernel,
        out_shape=jax.ShapeDtypeStruct((n_tiles, 1, TB), x.dtype),
        grid_spec=pltpu.PrefetchScalarGridSpec(
            num_scalar_prefetch=0,
            grid=(n_tiles,),
            in_specs=[
                pl.BlockSpec((TB, N), lambda i: (i, 0)),              # x (pipelined)
                pl.BlockSpec((N, H1), lambda i: (0, 0), **_RESIDENT),  # W1
                pl.BlockSpec((1, H1), lambda i: (0, 0), **_RESIDENT),  # b1
                pl.BlockSpec((H1, H2), lambda i: (0, 0), **_RESIDENT),  # W2
                pl.BlockSpec((1, H2), lambda i: (0, 0), **_RESIDENT),  # b2
                pl.BlockSpec((1, H2), lambda i: (0, 0), **_RESIDENT),  # W3 row
                pl.BlockSpec((1, 1), lambda i: (0, 0), **_RESIDENT),   # b3
            ],
            out_specs=pl.BlockSpec((1, 1, TB), lambda i: (i, 0, 0)),
        ),
        compiler_params=pltpu.CompilerParams(
            dimension_semantics=("parallel",),
            vmem_limit_bytes=_vmem_limit_bytes(N, H1, H2, TB),
        ),
    )(x, w1b, b1, w2b, b2, w3row, b3)

    return out.reshape(B_pad, 1)[:B]


def init_params(key, N):
    """Deterministic init mimicking torch.nn.Linear defaults
    (uniform in [-1/sqrt(fan_in), 1/sqrt(fan_in)]).
    Weights stored as (in, out) so the kernel computes x @ W."""
    H1, H2 = 64 * N, 32 * N
    keys = jax.random.split(key, 6)

    def lin(kw, kb, fan_in, fan_out):
        bound = 1.0 / jnp.sqrt(jnp.float32(fan_in))
        w = jax.random.uniform(kw, (fan_in, fan_out), jnp.float32, -bound, bound)
        b = jax.random.uniform(kb, (1, fan_out), jnp.float32, -bound, bound)
        return w, b

    return (lin(keys[0], keys[1], N, H1),
            lin(keys[2], keys[3], H1, H2),
            lin(keys[4], keys[5], H2, 1))


def reference_forward(x, params):
    # Pure-f32 JAX reference of the PyTorch forward.
    (w1, b1), (w2, b2), (w3, b3) = params
    h1 = jnp.maximum(x @ w1 + b1, 0.0)
    h2 = jnp.maximum(h1 @ w2 + b2, 0.0)
    z = h2 @ w3 + b3
    return 1.0 / (1.0 + jnp.exp(-z))


def reference_forward_bf16(x, params):
    # Reference with the same bf16-operand / f32-accumulate matmul scheme.
    (w1, b1), (w2, b2), (w3, b3) = params
    bf = jnp.bfloat16
    h1 = jnp.dot(x.astype(bf), w1.astype(bf), preferred_element_type=jnp.float32)
    h1 = jnp.maximum(h1 + b1, 0.0)
    h2 = jnp.dot(h1.astype(bf), w2.astype(bf), preferred_element_type=jnp.float32)
    h2 = jnp.maximum(h2 + b2, 0.0)
    z = jnp.dot(h2.astype(bf), w3.astype(bf), preferred_element_type=jnp.float32) + b3
    return 1.0 / (1.0 + jnp.exp(-z))


if __name__ == "__main__":
    key = jax.random.PRNGKey(0)
    k_x, k_p = jax.random.split(key)

    N = 8            # -> hidden dims 512 and 256, output dim 1
    B = 128          # batch rows -> 2 tiles of 64 rows (both v7x cores busy)
    x = jax.random.normal(k_x, (B, N), jnp.float32)
    params = init_params(k_p, N)

    out = jax.block_until_ready(mlp_forward(x, params))
    assert out.shape == (B, 1), out.shape

    # Tight check vs. a reference using the same bf16-operand / f32-accum dots.
    ref_bf16 = reference_forward_bf16(x, params)
    assert jnp.allclose(out, ref_bf16, atol=5e-3, rtol=5e-3), "mismatch vs bf16 reference"
    # Loose check vs. the pure-f32 torch-equivalent forward.
    ref_f32 = reference_forward(x, params)
    assert jnp.allclose(out, ref_f32, atol=5e-2, rtol=5e-2), "mismatch vs f32 reference"

    print("KERNEL_OK")
</pallas_src>

<mosaic_0001>
module attributes {stable_mosaic.version = 11 : i64} {
  func.func @_mlp_kernel(%arg0: i32, %arg1: memref<64x8xf32, #tpu.memory_space<vmem>>, %arg2: memref<8x512xbf16, #tpu.memory_space<vmem>>, %arg3: memref<1x512xf32, #tpu.memory_space<vmem>>, %arg4: memref<512x256xbf16, #tpu.memory_space<vmem>>, %arg5: memref<1x256xf32, #tpu.memory_space<vmem>>, %arg6: memref<1x256xbf16, #tpu.memory_space<vmem>>, %arg7: memref<1x1xf32, #tpu.memory_space<vmem>>, %arg8: memref<1x1x64xf32, #tpu.memory_space<vmem>>) attributes {dimension_semantics = [#tpu.dimension_semantics<parallel>], iteration_bounds = array<i64: 2>, scalar_prefetch = 0 : i64, scratch_operands = 0 : i64, tpu.core_type = #tpu.core_type<tc>, window_params = [{transform_indices = @transform_0, window_bounds = array<i64: 64, 8>}, {pipeline_mode = #tpu.pipeline_mode<synchronous>, transform_indices = @transform_1, window_bounds = array<i64: 8, 512>}, {pipeline_mode = #tpu.pipeline_mode<synchronous>, transform_indices = @transform_2, window_bounds = array<i64: 1, 512>}, {pipeline_mode = #tpu.pipeline_mode<synchronous>, transform_indices = @transform_3, window_bounds = array<i64: 512, 256>}, {pipeline_mode = #tpu.pipeline_mode<synchronous>, transform_indices = @transform_4, window_bounds = array<i64: 1, 256>}, {pipeline_mode = #tpu.pipeline_mode<synchronous>, transform_indices = @transform_5, window_bounds = array<i64: 1, 256>}, {pipeline_mode = #tpu.pipeline_mode<synchronous>, transform_indices = @transform_6, window_bounds = array<i64: 1, 1>}, {transform_indices = @transform_7, window_bounds = array<i64: 1, 1, 64>}]} {
    %c0 = arith.constant 0 : index
    %c0_0 = arith.constant 0 : index
    %0 = vector.load %arg1[%c0, %c0_0] : memref<64x8xf32, #tpu.memory_space<vmem>>, vector<64x8xf32>
    %1 = arith.truncf %0 : vector<64x8xf32> to vector<64x8xbf16>
    %c0_1 = arith.constant 0 : index
    %c0_2 = arith.constant 0 : index
    %2 = vector.load %arg2[%c0_1, %c0_2] : memref<8x512xbf16, #tpu.memory_space<vmem>>, vector<8x512xbf16>
    %cst = arith.constant dense<0.000000e+00> : vector<64x512xf32>
    %3 = tpu.matmul %1, %2, %cst {dimension_numbers = #tpu.dot_dimension_numbers<[1], [0], [0], [1], [0, 0, 1, 1], [], []>} : vector<64x8xbf16>, vector<8x512xbf16>, vector<64x512xf32> -> vector<64x512xf32>
    %c0_3 = arith.constant 0 : index
    %c0_4 = arith.constant 0 : index
    %4 = vector.load %arg3[%c0_3, %c0_4] : memref<1x512xf32, #tpu.memory_space<vmem>>, vector<1x512xf32>
    %5 = vector.broadcast %4 : vector<1x512xf32> to vector<64x512xf32>
    %6 = arith.addf %3, %5 : vector<64x512xf32>
    %cst_5 = arith.constant 0.000000e+00 : f32
    %7 = vector.broadcast %cst_5 : f32 to vector<64x512xf32>
    %8 = arith.maximumf %6, %7 : vector<64x512xf32>
    %9 = arith.truncf %8 : vector<64x512xf32> to vector<64x512xbf16>
    %c0_6 = arith.constant 0 : index
    %c0_7 = arith.constant 0 : index
    %10 = vector.load %arg4[%c0_6, %c0_7] : memref<512x256xbf16, #tpu.memory_space<vmem>>, vector<512x256xbf16>
    %cst_8 = arith.constant dense<0.000000e+00> : vector<64x256xf32>
    %11 = tpu.matmul %9, %10, %cst_8 {dimension_numbers = #tpu.dot_dimension_numbers<[1], [0], [0], [1], [0, 0, 1, 1], [], []>} : vector<64x512xbf16>, vector<512x256xbf16>, vector<64x256xf32> -> vector<64x256xf32>
    %c0_9 = arith.constant 0 : index
    %c0_10 = arith.constant 0 : index
    %12 = vector.load %arg5[%c0_9, %c0_10] : memref<1x256xf32, #tpu.memory_space<vmem>>, vector<1x256xf32>
    %13 = vector.broadcast %12 : vector<1x256xf32> to vector<64x256xf32>
    %14 = arith.addf %11, %13 : vector<64x256xf32>
    %cst_11 = arith.constant 0.000000e+00 : f32
    %15 = vector.broadcast %cst_11 : f32 to vector<64x256xf32>
    %16 = arith.maximumf %14, %15 : vector<64x256xf32>
    %c0_12 = arith.constant 0 : index
    %c0_13 = arith.constant 0 : index
    %17 = vector.load %arg6[%c0_12, %c0_13] : memref<1x256xbf16, #tpu.memory_space<vmem>>, vector<1x256xbf16>
    %18 = arith.truncf %16 : vector<64x256xf32> to vector<64x256xbf16>
    %cst_14 = arith.constant dense<0.000000e+00> : vector<1x64xf32>
    %19 = tpu.matmul %17, %18, %cst_14 {dimension_numbers = #tpu.dot_dimension_numbers<[1], [1], [0], [0], [0, 0, 1, 0], [], []>} : vector<1x256xbf16>, vector<64x256xbf16>, vector<1x64xf32> -> vector<1x64xf32>
    %c0_15 = arith.constant 0 : index
    %c0_16 = arith.constant 0 : index
    %20 = vector.load %arg7[%c0_15, %c0_16] : memref<1x1xf32, #tpu.memory_space<vmem>>, vector<1x1xf32>
    %21 = vector.broadcast %20 : vector<1x1xf32> to vector<1x64xf32>
    %22 = arith.addf %19, %21 : vector<1x64xf32>
    %cst_17 = arith.constant 0.000000e+00 : f32
    %23 = vector.broadcast %cst_17 : f32 to vector<1x64xf32>
    %24 = arith.subf %23, %22 : vector<1x64xf32>
    %25 = math.exp %24 : vector<1x64xf32>
    %cst_18 = arith.constant 1.000000e+00 : f32
    %26 = vector.broadcast %cst_18 : f32 to vector<1x64xf32>
    %27 = arith.addf %26, %25 : vector<1x64xf32>
    %cst_19 = arith.constant 1.000000e+00 : f32
    %28 = vector.broadcast %cst_19 : f32 to vector<1x64xf32>
    %29 = arith.divf %28, %27 : vector<1x64xf32>
    %c0_20 = arith.constant 0 : index
    %c0_21 = arith.constant 0 : index
    %c0_22 = arith.constant 0 : index
    %30 = vector.load %arg8[%c0_20, %c0_21, %c0_22] : memref<1x1x64xf32, #tpu.memory_space<vmem>>, vector<1x1x64xf32>
    %31 = vector.shape_cast %30 : vector<1x1x64xf32> to vector<1x64xf32>
    %32 = vector.shape_cast %29 : vector<1x64xf32> to vector<1x1x64xf32>
    tpu.vector_store %arg8[%c0_20, %c0_21, %c0_22], %32 {strides = array<i32>} : memref<1x1x64xf32, #tpu.memory_space<vmem>>, vector<1x1x64xf32>,
    return
  }
  func.func @transform_0(%arg0: i32) -> (i32, i32) {
    %c0_i32 = arith.constant 0 : i32
    %c0_i32_0 = arith.constant 0 : i32
    return %arg0, %c0_i32 : i32, i32
  }
  func.func @transform_1(%arg0: i32) -> (i32, i32) {
    %c0_i32 = arith.constant 0 : i32
    %c0_i32_0 = arith.constant 0 : i32
    %c0_i32_1 = arith.constant 0 : i32
    return %c0_i32, %c0_i32_0 : i32, i32
  }
  func.func @transform_2(%arg0: i32) -> (i32, i32) {
    %c0_i32 = arith.constant 0 : i32
    %c0_i32_0 = arith.constant 0 : i32
    %c0_i32_1 = arith.constant 0 : i32
    return %c0_i32, %c0_i32_0 : i32, i32
  }
  func.func @transform_3(%arg0: i32) -> (i32, i32) {
    %c0_i32 = arith.constant 0 : i32
    %c0_i32_0 = arith.constant 0 : i32
    %c0_i32_1 = arith.constant 0 : i32
    return %c0_i32, %c0_i32_0 : i32, i32
  }
  func.func @transform_4(%arg0: i32) -> (i32, i32) {
    %c0_i32 = arith.constant 0 : i32
    %c0_i32_0 = arith.constant 0 : i32
    %c0_i32_1 = arith.constant 0 : i32
    return %c0_i32, %c0_i32_0 : i32, i32
  }
  func.func @transform_5(%arg0: i32) -> (i32, i32) {
    %c0_i32 = arith.constant 0 : i32
    %c0_i32_0 = arith.constant 0 : i32
    %c0_i32_1 = arith.constant 0 : i32
    return %c0_i32, %c0_i32_0 : i32, i32
  }
  func.func @transform_6(%arg0: i32) -> (i32, i32) {
    %c0_i32 = arith.constant 0 : i32
    %c0_i32_0 = arith.constant 0 : i32
    %c0_i32_1 = arith.constant 0 : i32
    return %c0_i32, %c0_i32_0 : i32, i32
  }
  func.func @transform_7(%arg0: i32) -> (i32, i32, i32) {
    %c0_i32 = arith.constant 0 : i32
    %c0_i32_0 = arith.constant 0 : i32
    %c0_i32_1 = arith.constant 0 : i32
    return %arg0, %c0_i32, %c0_i32_0 : i32, i32, i32
  }
}

</mosaic_0001>

<bundles_post_ra>
// kernel: tpu_custom_call.1
= control target key start
LH: loop header
LB: loop body
LE: loop exit
PB: predicated region body
PF: predicated region fallthrough
CT: control target
= control target key end

     0   :  { %s1982_s0 = inlined_call_operand.vmem [shape: f32[128,8], index: 0, kind: input, shape index: {}]   ;;  %s1983_s1 = inlined_call_operand.vmem [shape: bf16[8,512], index: 1, kind: input, shape index: {}]   ;;  %s1984_s2 = inlined_call_operand.vmem [shape: f32[1,512], index: 2, kind: input, shape index: {}]   ;;  %s1985_s3 = inlined_call_operand.hbm [shape: bf16[512,256], index: 3, kind: input, shape index: {}]   ;;  %s1986_s4 = inlined_call_operand.vmem [shape: f32[1,256], index: 4, kind: input, shape index: {}]   ;;  %s1987_s5 = inlined_call_operand.vmem [shape: bf16[1,256], index: 5, kind: input, shape index: {}]   ;;  %s1988_s6 = inlined_call_operand.<no memory space> [shape: f32[1,1], index: 6, kind: input, shape index: {}]   ;;  %s1989_s7 = inlined_call_operand.hbm [shape: f32[2,1,64], index: 7, kind: output, shape index: {}]  }
   0x1   :  { %v12_v0 = vstv %s1988_s6 }
   0x2   :  { %13 = vst [vmem:[#allocation2] sm:$0x1] %v12_v0 }
   0x3   :  { %14 = vsyncpa [#allocation4], 0 }
   0x4   :  { %15 = vsyncpa [#allocation5], 0 }
   0x5   :  { %17 = vsyncpa [#allocation5 + $0x1], 0  ;;  %s1718_s26 = smov 0   ;;  %s1720_s27 = smov 0  }
   0x6   :  { %s1722_s28 = smov 0   ;;  %s1724_s29 = smov 0  }
   0x7 LB: > { %s1739_s6 = sadd.s32 4294967295, %s1667_s29   ;;  %s1292_s30 = sadd.s32 4294967294, %s1667_s29   ;;  %s1667_s29 = sphi %s1724_s29, %s2005_s29   ;;  %s1663_s28 = sphi %s1722_s28, %s2004_s28   ;;  %s1659_s27 = sphi %s1720_s27, %s2003_s27   ;;  %s1655_s26 = sphi %s1718_s26, %s2002_s26  }
   0x8   : > { %s1743_s8 = sadd.s32 1, %s1667_s29   ;;  %s182_s9 = sadd.s32 1, %s1663_s28 }
   0x9   : > { %s179_s10 = ssub.s32 %s1667_s29, %s1743_s8  ;;  %p192_p0 = scmp.ne.s32.totalorder %s1663_s28, %s1659_s27 }
   0xa   : > { %p180_p1 = scmp.eq.s32.totalorder %s179_s10, 0  ;;  %p193_p2 = scmp.eq.s32.totalorder %s1739_s6, 1 }
   0xb   : > { %p198_p3 = scmp.ne.s32.totalorder %s1659_s27, %s1655_s26  ;;  %p199_p4 = scmp.eq.s32.totalorder %s1292_s30, 1 }
   0xc   : > { %s1754_s11 = scalar_select %p180_p1, %s1663_s28, %s182_s9  }
   0xd   : > { %p1756_p5 = por %p193_p2, %p192_p0  ;;  %p1760_p6 = por %p199_p4, %p198_p3 }
   0xe   : > { %p1293_p7 = scmp.ge.s32.totalorder %s1667_s29, 1  ;;  %p206_p8 = scmp.lt.s32.totalorder %s1667_s29, 3 }
   0xf   : > { %s1993_s12 = scalar_select %p1756_p5, 1, 0 }
  0x10   : > { %s1994_s13 = scalar_select %p1760_p6, 1, 0 }
  0x11   : > { %p1990_p9 = scmp.eq.s32.totalorder %s1739_s6, 0  ;;  %p1767_p10 = pnand %p1293_p7, %p206_p8 }
  0x12   : > { %s1669_s15 = smov [#allocation3]   ;;  %s1573_s20 = scalar_lea.hbm %s1985_s3, 8192 }
  0x13   : > { %s1995_s14 = scalar_select %p1767_p10, 1, 0 }
  0x14   : > { %s224_s16 = sshll.u32 %s1669_s15, 4  ;;  %p1420_p11 = pneg %p1767_p10  ;;  %s225_s16 = int_to_ptr.vmem [resolvable:$true] %s224_s16 }
  0x15   : > { %p1574_p13 = scmp.ne.s32.totalorder %s1985_s3, %s1573_s20  ;;  %p1580_p3 = scmp.lt.u32.totalorder %s1573_s20, %s1985_s3 }
  0x16   : > { %p1775_p12 = pnand %p1990_p9, %p1420_p11 }
  0x18   : > { %p1575_p0 = pneg %p1775_p12 }
  0x1a   : > { %p1576_p1 = pnand %p1575_p0, %p1574_p13 }
  0x1c   : > { %p1577_p2 = pneg %p1576_p1 }
  0x1e   : > { %p1582_p4 = pnand %p1580_p3, %p1577_p2 }
  0x20   : > { %1585 = shalt.err (!%p1582_p4)
}
  0x21   : > { %s1586_s25 = scalar_lea.vmem %s225_s16, 8192  ;;  %p1594_p9 = scmp.lt.s32.totalorder %s225_s16, %s225_s16 }
  0x22   : > { %p1587_p7 = scmp.ne.s32.totalorder %s225_s16, %s1586_s25  ;;  %p1595_p6 = scmp.lt.s32.totalorder %s1586_s25, %s1586_s25 }
  0x24   : > { %p1589_p8 = pnand %p1587_p7, %p1575_p0  ;;  %p1596_p5 = por %p1595_p6, %p1594_p9 }
  0x26   : > { %p1590_p11 = pneg %p1589_p8 }
  0x28   : > { %p1597_p10 = pnand %p1596_p5, %p1590_p11 }
  0x2a   : > { %1600 = shalt.err (!%p1597_p10)
}
  0x2b   : > { %s1670_s30 = smov 128   ;;  %s1671_s9 = smov 8  }
  0x2c   : > { %1423 = dma.hbm_to_vmem [thread:$0]  (!%p1775_p12), %s1985_s3, 8192, %s225_s16, [#allocation4], %s1670_s30, %s1670_s30, %s1671_s9  }
  0x2d   : > { %p1997_p13 = scmp.ne.s32.totalorder %s1995_s14, 0 }
  0x2e   : > { %p1998_p1 = scmp.eq.s32.totalorder (!%p1997_p13), %s1739_s6, 0 }
  0x2f   : > { %258 = sbr.rel (%p1997_p13) target bundleno = 797 (0x31d), region = 48 }
  0x36   : > { %1646 = dma.done.wait (%p1998_p1), [#allocation4], 8192   ;;  %p1999_p0 = pmov %p1998_p1 }
  0x37   : > { %s1298_s18 = sshll.u32 %s1739_s6, 3  ;;  %v1672_v1 = vmov 0   ;;  %v308_v2 = vld [vmem:[%s1983_s1] sm:$0xff]  ;;  %vm355_vm0 = vcmask 1043456   ;;  %v309_v3 = vld [vmem:[%s1983_s1 + $0x8] sm:$0xff]  ;;  %vm342_vm1 = vcmask 64512  }
  0x38   : > { %1648 = vsyncadd (%p1999_p0), [#allocation4], 4294959104  ;;  %400 = vmatprep.mubr.bf16.mxu0 %v1672_v1  ;;  %473 = vmatprep.mubr.bf16.mxu1 %v1672_v1  ;;  %p290_p5 = scmp.lt.s32.totalorder %s1298_s18, 15  ;;  %v1301_v5 = vcombine.high %v308_v2, %v308_v2  ;;  %v1303_v6 = vcombine.high %v309_v3, %v309_v3  ;;  %v1300_v7 = vcombine.low %v308_v2, %v308_v2  ;;  %v1475_v13 = vld [vmem:[#allocation3 + $0x4] ss:$8 sps:$4 sm:$0xff]   ;;  %vm1210_vm2 = vcmask 516096  }
  0x39   : > { %1468 = vset.pattern.permute.xlu0 %v1672_v1  ;;  %v1302_v8 = vcombine.low %v309_v3, %v309_v3  ;;  %v1473_v14 = vld [vmem:[#allocation3] ss:$8 sps:$4 sm:$0xff]   ;;  %v1478_v15 = vld [vmem:[#allocation3 + $0x104] ss:$8 sps:$4 sm:$0xff]   ;;  %v1481_v18 = vld [vmem:[#allocation3 + $0x14] ss:$8 sps:$4 sm:$0xff]  }
  0x3a   : > { %s2007_s18 = smov (!%p290_p5, %s1298_s18), 15  ;;  %1304 = vmatprep.subr.msk.bf16.mxu0 %vm355_vm0, %v1301_v5  ;;  %1309 = vmatprep.subr.msk.bf16.mxu1 %vm355_vm0, %v1303_v6  ;;  %v357_v10 = vsel %vm355_vm0, %v1300_v7, 0  ;;  %v1476_v17 = vld [vmem:[#allocation3 + $0x100] ss:$8 sps:$4 sm:$0xff]   ;;  %v1484_v20 = vld [vmem:[#allocation3 + $0x114] ss:$8 sps:$4 sm:$0xff]  }
  0x3b   : > { %s1299_s16 = sshll.u32 %s2007_s18, 3  ;;  %v363_v11 = vsel %vm355_vm0, %v1302_v8, 0  ;;  %369 = vmatpush1.bf16.msra.mxu0 %v357_v10  ;;  %v1479_v21 = vld [vmem:[#allocation3 + $0x10] ss:$8 sps:$4 sm:$0xff]   ;;  %v1487_v23 = vld [vmem:[#allocation3 + $0x24] ss:$8 sps:$4 sm:$0xff]  }
  0x3c   : > { %s1808_s19 = scalar_lea.vmem %s1982_s0, %s1299_s16  ;;  %442 = vmatpush1.bf16.msra.mxu1 %v363_v11  ;;  %1031 = vmatprep.subr.bf16.mxu0 %v1478_v15  ;;  %v1482_v22 = vld [vmem:[#allocation3 + $0x110] ss:$8 sps:$4 sm:$0xff]   ;;  %v1485_v25 = vld [vmem:[#allocation3 + $0x20] ss:$8 sps:$4 sm:$0xff]   ;;  %v1490_v27 = vld [vmem:[#allocation3 + $0x124] ss:$8 sps:$4 sm:$0xff]  }
  0x3d   : > { %v296_v4 = vld [vmem:[%s1808_s19] sm:$0xff]  ;;  %v297_v9 = vld [vmem:[%s1808_s19 + $0x8] sm:$0xff]  ;;  %v298_v16 = vld [vmem:[%s1808_s19 + $0x10] sm:$0xff]  ;;  %958 = vmatprep.subr.bf16.mxu1 %v1475_v13  ;;  %s287_s18 = sand.u32 1, %s1659_s27   ;;  %s1379_s16 = sshll.u32 %s1739_s6, 4 }
  0x3e   : > { %v304_v12 = vpack.c.bf16 %v297_v9, %v296_v4  ;;  %v299_v19 = vld [vmem:[%s1808_s19 + $0x18] sm:$0xff]  ;;  %v1488_v26 = vld [vmem:[#allocation3 + $0x120] ss:$8 sps:$4 sm:$0xff]   ;;  %v1499_v34 = vld [vmem:[#allocation3 + $0x44] ss:$8 sps:$4 sm:$0xff]   ;;  %s288_s14 = scalar_lea.vmem [#allocation6], %s287_s18  ;;  %s1940_s21 = scalar_lea.hbm %s1989_s7, %s1379_s16 }
  0x3f   : > { %v305_v24 = vpack.c.bf16 %v299_v19, %v298_v16  ;;  %v1493_v28 = vld [vmem:[#allocation3 + $0x34] ss:$8 sps:$4 sm:$0xff]   ;;  %v301_v31 = vld [vmem:[%s1808_s19 + $0x28] sm:$0xff]  ;;  %v1491_v32 = vld [vmem:[#allocation3 + $0x30] ss:$8 sps:$4 sm:$0xff]   ;;  %s1225_s17 = sshll.u32 %s288_s14, 4  ;;  %s1942_s17 = int_to_ptr.vmem [resolvable:$true] %s1225_s17 }
  0x40   : > { %1305 = vmatmul.mubr.msk.bf16.vlgmr.msra.gmra.mrb[0].mxu0 %vm342_vm1, %v304_v12  ;;  %1310 = vmatmul.mubr.msk.bf16.vlgmr.msra.gmra.mrb[0].mxu1 %vm342_vm1, %v304_v12  ;;  %v1496_v29 = vld [vmem:[#allocation3 + $0x134] ss:$8 sps:$4 sm:$0xff]   ;;  %v1494_v33 = vld [vmem:[#allocation3 + $0x130] ss:$8 sps:$4 sm:$0xff]   ;;  %v1497_v36 = vld [vmem:[#allocation3 + $0x40] ss:$8 sps:$4 sm:$0xff]  }
  0x41   : > { %410 = vmatprep.mubr.bf16.mxu0 %v1672_v1  ;;  %483 = vmatprep.mubr.bf16.mxu1 %v1672_v1  ;;  %v300_v30 = vld [vmem:[%s1808_s19 + $0x20] sm:$0xff]  ;;  %v302_v41 = vld [vmem:[%s1808_s19 + $0x30] sm:$0xff]  ;;  %v303_v42 = vld [vmem:[%s1808_s19 + $0x38] sm:$0xff]  ;;  %s1213_s22 = scalar_lea.sflag [#allocation5], %s287_s18  ;;  %s1601_s23 = scalar_lea.vmem %s1942_s17, 16 }
  0x42   : > { %959 = vmatpush1.bf16.msra.mxu1 %v1473_v14  ;;  %1032 = vmatpush1.bf16.msra.mxu0 %v1476_v17  ;;  %v306_v35 = vpack.c.bf16 %v301_v31, %v300_v30  ;;  %v1500_v37 = vld [vmem:[#allocation3 + $0x140] ss:$8 sps:$4 sm:$0xff]   ;;  %v1502_v38 = vld [vmem:[#allocation3 + $0x144] ss:$8 sps:$4 sm:$0xff]   ;;  %v1505_v39 = vld [vmem:[#allocation3 + $0x54] ss:$8 sps:$4 sm:$0xff]   ;;  %v307_v46 = vpack.c.bf16 %v303_v42, %v302_v41  ;;  %p1602_p6 = scmp.ne.s32.totalorder %s1942_s17, %s1601_s23 }
  0x43   : > { %960 = vmatprep.subr.bf16.mxu1 %v1481_v18  ;;  %1033 = vmatprep.subr.bf16.mxu0 %v1484_v20  ;;  %v1508_v40 = vld [vmem:[#allocation3 + $0x154] ss:$8 sps:$4 sm:$0xff]   ;;  %v1503_v43 = vld [vmem:[#allocation3 + $0x50] ss:$8 sps:$4 sm:$0xff]   ;;  %v1511_v45 = vld [vmem:[#allocation3 + $0x64] ss:$8 sps:$4 sm:$0xff]  }
  0x44   : > { %v1506_v44 = vld [vmem:[#allocation3 + $0x150] ss:$8 sps:$4 sm:$0xff]   ;;  %v1514_v47 = vld [vmem:[#allocation3 + $0x164] ss:$8 sps:$4 sm:$0xff]   ;;  %v1509_v48 = vld [vmem:[#allocation3 + $0x60] ss:$8 sps:$4 sm:$0xff]  }
  0x45   : > { %v1512_v49 = vld [vmem:[#allocation3 + $0x160] ss:$8 sps:$4 sm:$0xff]   ;;  %v1517_v50 = vld [vmem:[#allocation3 + $0x74] ss:$8 sps:$4 sm:$0xff]   ;;  %v1515_v52 = vld [vmem:[#allocation3 + $0x70] ss:$8 sps:$4 sm:$0xff]  }
  0x46   : > { %961 = vmatpush1.bf16.msra.mxu1 %v1479_v21  ;;  %1034 = vmatpush1.bf16.msra.mxu0 %v1482_v22  ;;  %v1520_v51 = vld [vmem:[#allocation3 + $0x174] ss:$8 sps:$4 sm:$0xff]   ;;  %v1518_v53 = vld [vmem:[#allocation3 + $0x170] ss:$8 sps:$4 sm:$0xff]   ;;  %v1523_v54 = vld [vmem:[#allocation3 + $0x84] ss:$8 sps:$4 sm:$0xff]   ;;  %v312_v22 = vlaneseq }
  0x47   : > { %962 = vmatprep.subr.bf16.mxu1 %v1487_v23  ;;  %1035 = vmatprep.subr.bf16.mxu0 %v1490_v27  ;;  %v1526_v55 = vld [vmem:[#allocation3 + $0x184] ss:$8 sps:$4 sm:$0xff]   ;;  %v1521_v56 = vld [vmem:[#allocation3 + $0x80] ss:$8 sps:$4 sm:$0xff]   ;;  %v1529_v58 = vld [vmem:[#allocation3 + $0x94] ss:$8 sps:$4 sm:$0xff]  }
  0x48   : > { %1306 = vmatmul.mubr.msk.bf16.gmra.mrb[4].mxu0 %vm342_vm1, %v305_v24  ;;  %1311 = vmatmul.mubr.msk.bf16.gmra.mrb[4].mxu1 %vm342_vm1, %v305_v24  ;;  %v1524_v57 = vld [vmem:[#allocation3 + $0x180] ss:$8 sps:$4 sm:$0xff]   ;;  %v1532_v59 = vld [vmem:[#allocation3 + $0x194] ss:$8 sps:$4 sm:$0xff]   ;;  %v1527_v60 = vld [vmem:[#allocation3 + $0x90] ss:$8 sps:$4 sm:$0xff]  }
  0x49   : > { %420 = vmatprep.mubr.bf16.mxu0 %v1672_v1  ;;  %493 = vmatprep.mubr.bf16.mxu1 %v1672_v1  ;;  %v1530_v61 = vld [vmem:[#allocation3 + $0x190] ss:$8 sps:$4 sm:$0xff]   ;;  %v1535_v62 = vld [vmem:[#allocation3 + $0xa4] ss:$8 sps:$4 sm:$0xff]   ;;  %v1533_v0 = vld [vmem:[#allocation3 + $0xa0] ss:$8 sps:$4 sm:$0xff]  }
  0x4a   : > { %963 = vmatpush1.bf16.msra.mxu1 %v1485_v25  ;;  %1036 = vmatpush1.bf16.msra.mxu0 %v1488_v26  ;;  %v1538_v63 = vld [vmem:[#allocation3 + $0x1a4] ss:$8 sps:$4 sm:$0xff]   ;;  %v1541_v2 = vld [vmem:[#allocation3 + $0xb4] ss:$8 sps:$4 sm:$0xff]   ;;  %v1539_v4 = vld [vmem:[#allocation3 + $0xb0] ss:$8 sps:$4 sm:$0xff]  }
  0x4b   : > { %964 = vmatprep.subr.bf16.mxu1 %v1493_v28  ;;  %1037 = vmatprep.subr.bf16.mxu0 %v1496_v29  ;;  %v1544_v3 = vld [vmem:[#allocation3 + $0x1b4] ss:$8 sps:$4 sm:$0xff]   ;;  %v1542_v5 = vld [vmem:[#allocation3 + $0x1b0] ss:$8 sps:$4 sm:$0xff]   ;;  %v1547_v6 = vld [vmem:[#allocation3 + $0xc4] ss:$8 sps:$4 sm:$0xff]  }
  0x4c   : > { %v1550_v7 = vld [vmem:[#allocation3 + $0x1c4] ss:$8 sps:$4 sm:$0xff]   ;;  %v1545_v8 = vld [vmem:[#allocation3 + $0xc0] ss:$8 sps:$4 sm:$0xff]   ;;  %v1553_v10 = vld [vmem:[#allocation3 + $0xd4] ss:$8 sps:$4 sm:$0xff]  }
  0x4d   : > { %v1548_v9 = vld [vmem:[#allocation3 + $0x1c0] ss:$8 sps:$4 sm:$0xff]   ;;  %v1556_v11 = vld [vmem:[#allocation3 + $0x1d4] ss:$8 sps:$4 sm:$0xff]   ;;  %v1551_v12 = vld [vmem:[#allocation3 + $0xd0] ss:$8 sps:$4 sm:$0xff]  }
  0x4e   : > { %965 = vmatpush1.bf16.msra.mxu1 %v1491_v32  ;;  %1038 = vmatpush1.bf16.msra.mxu0 %v1494_v33  ;;  %v1554_v13 = vld [vmem:[#allocation3 + $0x1d0] ss:$8 sps:$4 sm:$0xff]   ;;  %v1559_v14 = vld [vmem:[#allocation3 + $0xe4] ss:$8 sps:$4 sm:$0xff]   ;;  %v1557_v16 = vld [vmem:[#allocation3 + $0xe0] ss:$8 sps:$4 sm:$0xff]  }
  0x4f   : > { %966 = vmatprep.subr.bf16.mxu1 %v1499_v34  ;;  %1039 = vmatprep.subr.bf16.mxu0 %v1502_v38  ;;  %v1562_v15 = vld [vmem:[#allocation3 + $0x1e4] ss:$8 sps:$4 sm:$0xff]   ;;  %v1560_v17 = vld [vmem:[#allocation3 + $0x1e0] ss:$8 sps:$4 sm:$0xff]   ;;  %v1565_v18 = vld [vmem:[#allocation3 + $0xf4] ss:$8 sps:$4 sm:$0xff]  }
  0x50   : > { %1307 = vmatmul.mubr.msk.bf16.gmra.mrb[8].mxu0 %vm342_vm1, %v306_v35  ;;  %1312 = vmatmul.mubr.msk.bf16.gmra.mrb[8].mxu1 %vm342_vm1, %v306_v35  ;;  %v1568_v19 = vld [vmem:[#allocation3 + $0x1f4] ss:$8 sps:$4 sm:$0xff]   ;;  %v1563_v20 = vld [vmem:[#allocation3 + $0xf0] ss:$8 sps:$4 sm:$0xff]   ;;  %v1838_v23 = vshrl.u32 %v312_v22, 7  ;;  %p2000_p9 = scmp.ne.s32.totalorder %s1993_s12, 0 }
  0x51   : > { %430 = vmatprep.mubr.bf16.mxu0 %v1672_v1  ;;  %503 = vmatprep.mubr.bf16.mxu1 %v1672_v1  ;;  %v1536_v1 = vld [vmem:[#allocation3 + $0x1a0] ss:$8 sps:$4 sm:$0xff]   ;;  %v1566_v21 = vld [vmem:[#allocation3 + $0x1f0] ss:$8 sps:$4 sm:$0xff]   ;;  %s1674_s6 = smov [#allocation6]  }
  0x52   : > { %967 = vmatpush1.bf16.msra.mxu1 %v1497_v36  ;;  %1040 = vmatpush1.bf16.msra.mxu0 %v1500_v37  ;;  %v1841_v24 = vsub.s32 0, %v1838_v23  ;;  %v322_v25 = vsub.s32 2, %v1838_v23  ;;  %v310_v26 = vld [vmem:[%s1984_s2] sm:$0xf]  ;;  %v318_v27 = vsub.s32 1, %v1838_v23  ;;  %v326_v28 = vsub.s32 3, %v1838_v23  ;;  %p1603_p10 = pnand %p1602_p6, %p2000_p9 }
  0x53   : > { %968 = vmatprep.subr.bf16.mxu1 %v1505_v39  ;;  %1041 = vmatprep.subr.bf16.mxu0 %v1508_v40  ;;  %s1605_s24 = sshll.u32 %s1674_s6, 4  ;;  %s1606_s24 = int_to_ptr.vmem [resolvable:$false] %s1605_s24 }
  0x54   : > { %v1850_v29 = vrot.slane %v310_v26, %v1841_v24  ;;  %v1852_v30 = vrot.slane %v310_v26, %v322_v25  ;;  %v1856_v31 = vrot.slane %v310_v26, %v318_v27  ;;  %v1858_v32 = vrot.slane %v310_v26, %v326_v28  ;;  %p1604_p12 = pneg %p1603_p10  ;;  %s1607_s25 = scalar_lea.vmem %s1606_s24, 32 }
  0x55   : > { %p1608_p2 = scmp.lt.s32.totalorder %s1942_s17, %s1606_s24  ;;  %p1609_p3 = scmp.lt.s32.totalorder %s1607_s25, %s1601_s23 }
  0x56   : > { %969 = vmatpush1.bf16.msra.mxu1 %v1503_v43  ;;  %1042 = vmatpush1.bf16.msra.mxu0 %v1506_v44 }
  0x57   : > { %970 = vmatprep.subr.bf16.mxu1 %v1511_v45  ;;  %1043 = vmatprep.subr.bf16.mxu0 %v1514_v47  ;;  %p1610_p4 = por %p1609_p3, %p1608_p2 }
  0x58   : > { %1308 = vmatmul.mubr.msk.bf16.gmra.mrb[12].mxu0 %vm342_vm1, %v307_v46  ;;  %1313 = vmatmul.mubr.msk.bf16.gmra.mrb[12].mxu1 %vm342_vm1, %v307_v46 }
  0x59   : > { %p1611_p7 = pnand %p1610_p4, %p1604_p12 }
  0x5a   : > { %971 = vmatpush1.bf16.msra.mxu1 %v1509_v48  ;;  %1044 = vmatpush1.bf16.msra.mxu0 %v1512_v49 }
  0x5b   : > { %972 = vmatprep.subr.bf16.mxu1 %v1517_v50  ;;  %1045 = vmatprep.subr.bf16.mxu0 %v1520_v51 }
  0x5e   : > { %973 = vmatpush1.bf16.msra.mxu1 %v1515_v52  ;;  %1046 = vmatpush1.bf16.msra.mxu0 %v1518_v53 }
  0x5f   : > { %974 = vmatprep.subr.bf16.mxu1 %v1523_v54  ;;  %1047 = vmatprep.subr.bf16.mxu0 %v1526_v55 }
  0x62   : > { %975 = vmatpush1.bf16.msra.mxu1 %v1521_v56  ;;  %1048 = vmatpush1.bf16.msra.mxu0 %v1524_v57 }
  0x63   : > { %976 = vmatprep.subr.bf16.mxu1 %v1529_v58  ;;  %1049 = vmatprep.subr.bf16.mxu0 %v1532_v59 }
  0x66   : > { %977 = vmatpush1.bf16.msra.mxu1 %v1527_v60  ;;  %1050 = vmatpush1.bf16.msra.mxu0 %v1530_v61 }
  0x67   : > { %978 = vmatprep.subr.bf16.mxu1 %v1535_v62  ;;  %1051 = vmatprep.subr.bf16.mxu0 %v1538_v63 }
  0x6a   : > { %979 = vmatpush1.bf16.msra.mxu1 %v1533_v0  ;;  %1052 = vmatpush1.bf16.msra.mxu0 %v1536_v1 }
  0x6b   : > { %980 = vmatprep.subr.bf16.mxu1 %v1541_v2  ;;  %1053 = vmatprep.subr.bf16.mxu0 %v1544_v3 }
  0x6e   : > { %981 = vmatpush1.bf16.msra.mxu1 %v1539_v4  ;;  %1054 = vmatpush1.bf16.msra.mxu0 %v1542_v5 }
  0x6f   : > { %982 = vmatprep.subr.bf16.mxu1 %v1547_v6  ;;  %1055 = vmatprep.subr.bf16.mxu0 %v1550_v7 }
  0x72   : > { %983 = vmatpush1.bf16.msra.mxu1 %v1545_v8  ;;  %1056 = vmatpush1.bf16.msra.mxu0 %v1548_v9 }
  0x73   : > { %984 = vmatprep.subr.bf16.mxu1 %v1553_v10  ;;  %1057 = vmatprep.subr.bf16.mxu0 %v1556_v11 }
  0x76   : > { %985 = vmatpush1.bf16.msra.mxu1 %v1551_v12  ;;  %1058 = vmatpush1.bf16.msra.mxu0 %v1554_v13 }
  0x77   : > { %986 = vmatprep.subr.bf16.mxu1 %v1559_v14  ;;  %1059 = vmatprep.subr.bf16.mxu0 %v1562_v15 }
  0x7a   : > { %987 = vmatpush1.bf16.msra.mxu1 %v1557_v16  ;;  %1060 = vmatpush1.bf16.msra.mxu0 %v1560_v17 }
  0x7b   : > { %988 = vmatprep.subr.bf16.mxu1 %v1565_v18  ;;  %1061 = vmatprep.subr.bf16.mxu0 %v1568_v19 }
  0x7e   : > { %989 = vmatpush1.bf16.msra.mxu1 %v1563_v20  ;;  %1062 = vmatpush1.bf16.msra.mxu0 %v1566_v21 }
 0x113   : > { %v402_v33 = vpop.f32.mrb[0].mxu0  ;;  %v475_v34 = vpop.f32.mrb[0].mxu1 }
 0x114   : > { %v403_v35 = vadd.f32 %v402_v33, %v1850_v29  ;;  %v476_v36 = vadd.f32 %v475_v34, %v1852_v30  ;;  %v404_v37 = vpop.f32.mrb[1].mxu0  ;;  %v477_v38 = vpop.f32.mrb[1].mxu1 }
 0x115   : > { %v405_v39 = vadd.f32 %v404_v37, %v1856_v31  ;;  %v478_v40 = vadd.f32 %v477_v38, %v1858_v32  ;;  %v406_v41 = vpop.f32.mrb[2].mxu0  ;;  %v479_v42 = vpop.f32.mrb[2].mxu1 }
 0x116   : > { %v516_v43 = vmax.f32 %v476_v36, 0.0  ;;  %v407_v44 = vadd.f32 %v406_v41, %v1850_v29  ;;  %v480_v45 = vadd.f32 %v479_v42, %v1852_v30  ;;  %v408_v46 = vpop.f32.mrb[3].mxu0  ;;  %v481_v47 = vpop.f32.mrb[3].mxu1  ;;  %v514_v51 = vmax.f32 %v403_v35, 0.0 }
 0x117   : > { %v517_v48 = vmax.f32 %v478_v40, 0.0  ;;  %v409_v49 = vadd.f32 %v408_v46, %v1856_v31  ;;  %v482_v50 = vadd.f32 %v481_v47, %v1858_v32  ;;  %v515_v54 = vmax.f32 %v405_v39, 0.0 }
 0x118   : > { %v518_v52 = vmax.f32 %v407_v44, 0.0  ;;  %v520_v53 = vmax.f32 %v480_v45, 0.0 }
 0x119   : > { %v519_v55 = vmax.f32 %v409_v49, 0.0  ;;  %v521_v56 = vmax.f32 %v482_v50, 0.0 }
 0x11a   : > { %v546_v57 = vpack.c.bf16 %v518_v52, %v514_v51  ;;  %v548_v58 = vpack.c.bf16 %v520_v53, %v516_v43 }
 0x11b   : > { %v547_v59 = vpack.c.bf16 %v519_v55, %v515_v54  ;;  %v549_v60 = vpack.c.bf16 %v521_v56, %v517_v48  ;;  %v412_v61 = vpop.f32.mrb[4].mxu0  ;;  %v485_v62 = vpop.f32.mrb[4].mxu1 }
 0x11c   : > { %v413_v63 = vadd.f32 %v412_v61, %v1850_v29  ;;  %v486_v0 = vadd.f32 %v485_v62, %v1852_v30  ;;  %v414_v1 = vpop.f32.mrb[5].mxu0  ;;  %v487_v2 = vpop.f32.mrb[5].mxu1 }
 0x11d   : > { %v415_v3 = vadd.f32 %v414_v1, %v1856_v31  ;;  %v488_v4 = vadd.f32 %v487_v2, %v1858_v32  ;;  %v416_v5 = vpop.f32.mrb[6].mxu0  ;;  %v489_v6 = vpop.f32.mrb[6].mxu1  ;;  %990 = vmatprep.mubr.bf16.mxu1 %v547_v59  ;;  %1063 = vmatprep.mubr.bf16.mxu0 %v549_v60 }
 0x11e   : > { %v524_v7 = vmax.f32 %v486_v0, 0.0  ;;  %v417_v8 = vadd.f32 %v416_v5, %v1850_v29  ;;  %v490_v9 = vadd.f32 %v489_v6, %v1852_v30  ;;  %v418_v10 = vpop.f32.mrb[7].mxu0  ;;  %v491_v11 = vpop.f32.mrb[7].mxu1  ;;  %991 = vmatmul.mubr.bf16.vlgmr.msra.gmra.mrb[16].mxu1 %v546_v57  ;;  %1064 = vmatmul.mubr.bf16.vlgmr.msra.gmra.mrb[16].mxu0 %v548_v58  ;;  %v522_v15 = vmax.f32 %v413_v63, 0.0 }
 0x11f   : > { %v525_v12 = vmax.f32 %v488_v4, 0.0  ;;  %v419_v13 = vadd.f32 %v418_v10, %v1856_v31  ;;  %v492_v14 = vadd.f32 %v491_v11, %v1858_v32  ;;  %v523_v18 = vmax.f32 %v415_v3, 0.0 }
 0x120   : > { %v526_v16 = vmax.f32 %v417_v8, 0.0  ;;  %v528_v17 = vmax.f32 %v490_v9, 0.0 }
 0x121   : > { %v527_v19 = vmax.f32 %v419_v13, 0.0  ;;  %v529_v20 = vmax.f32 %v492_v14, 0.0 }
 0x122   : > { %v550_v21 = vpack.c.bf16 %v526_v16, %v522_v15  ;;  %v552_v22 = vpack.c.bf16 %v528_v17, %v524_v7 }
 0x123   : > { %v551_v25 = vpack.c.bf16 %v527_v19, %v523_v18  ;;  %v553_v26 = vpack.c.bf16 %v529_v20, %v525_v12  ;;  %v422_v28 = vpop.f32.mrb[8].mxu0  ;;  %v495_v33 = vpop.f32.mrb[8].mxu1 }
 0x124   : > { %v423_v34 = vadd.f32 %v422_v28, %v1850_v29  ;;  %v496_v35 = vadd.f32 %v495_v33, %v1852_v30  ;;  %v424_v36 = vpop.f32.mrb[9].mxu0  ;;  %v497_v37 = vpop.f32.mrb[9].mxu1 }
 0x125   : > { %v425_v38 = vadd.f32 %v424_v36, %v1856_v31  ;;  %v498_v39 = vadd.f32 %v497_v37, %v1858_v32  ;;  %v426_v40 = vpop.f32.mrb[10].mxu0  ;;  %v499_v41 = vpop.f32.mrb[10].mxu1  ;;  %1000 = vmatprep.mubr.bf16.mxu1 %v551_v25  ;;  %1073 = vmatprep.mubr.bf16.mxu0 %v553_v26  ;;  %v626_v36 = vld [vmem:[%s1986_s4] sm:$0x3] }
 0x126   : > { %v532_v42 = vmax.f32 %v496_v35, 0.0  ;;  %v427_v43 = vadd.f32 %v426_v40, %v1850_v29  ;;  %v500_v44 = vadd.f32 %v499_v41, %v1852_v30  ;;  %v428_v45 = vpop.f32.mrb[11].mxu0  ;;  %v501_v46 = vpop.f32.mrb[11].mxu1  ;;  %1001 = vmatmul.mubr.bf16.gmra.mrb[20].mxu1 %v550_v21  ;;  %1074 = vmatmul.mubr.bf16.gmra.mrb[20].mxu0 %v552_v22  ;;  %v530_v50 = vmax.f32 %v423_v34, 0.0  ;;  %v1129_v35 = vld [vmem:[#allocation2] sm:$0x1] }
 0x127   : > { %v533_v47 = vmax.f32 %v498_v39, 0.0  ;;  %v429_v48 = vadd.f32 %v428_v45, %v1856_v31  ;;  %v502_v49 = vadd.f32 %v501_v46, %v1858_v32  ;;  %v531_v53 = vmax.f32 %v425_v38, 0.0  ;;  %1132 = vperm.xlu0 %1468, %v1129_v35  }
 0x128   : > { %v534_v51 = vmax.f32 %v427_v43, 0.0  ;;  %v536_v52 = vmax.f32 %v500_v44, 0.0  ;;  %v1909_v37 = vrot.slane %v626_v36, %v1841_v24  ;;  %v1913_v38 = vrot.slane %v626_v36, %v318_v27 }
 0x129   : > { %v535_v54 = vmax.f32 %v429_v48, 0.0  ;;  %v537_v55 = vmax.f32 %v502_v49, 0.0 }
 0x12a   : > { %v554_v56 = vpack.c.bf16 %v534_v51, %v530_v50  ;;  %v556_v57 = vpack.c.bf16 %v536_v52, %v532_v42 }
 0x12b   : > { %v555_v58 = vpack.c.bf16 %v535_v54, %v531_v53  ;;  %v557_v59 = vpack.c.bf16 %v537_v55, %v533_v47  ;;  %v432_v60 = vpop.f32.mrb[12].mxu0  ;;  %v505_v61 = vpop.f32.mrb[12].mxu1 }
 0x12c   : > { %v433_v62 = vadd.f32 %v432_v60, %v1850_v29  ;;  %v506_v63 = vadd.f32 %v505_v61, %v1852_v30  ;;  %v434_v0 = vpop.f32.mrb[13].mxu0  ;;  %v507_v1 = vpop.f32.mrb[13].mxu1 }
 0x12d   : > { %v435_v2 = vadd.f32 %v434_v0, %v1856_v31  ;;  %v508_v3 = vadd.f32 %v507_v1, %v1858_v32  ;;  %v436_v4 = vpop.f32.mrb[14].mxu0  ;;  %v509_v5 = vpop.f32.mrb[14].mxu1  ;;  %1010 = vmatprep.mubr.bf16.mxu1 %v555_v58  ;;  %1083 = vmatprep.mubr.bf16.mxu0 %v557_v59 }
 0x12e   : > { %v540_v6 = vmax.f32 %v506_v63, 0.0  ;;  %v437_v7 = vadd.f32 %v436_v4, %v1850_v29  ;;  %v510_v8 = vadd.f32 %v509_v5, %v1852_v30  ;;  %v438_v9 = vpop.f32.mrb[15].mxu0  ;;  %v511_v10 = vpop.f32.mrb[15].mxu1  ;;  %1011 = vmatmul.mubr.bf16.gmra.mrb[24].mxu1 %v554_v56  ;;  %1084 = vmatmul.mubr.bf16.gmra.mrb[24].mxu0 %v556_v57  ;;  %v538_v14 = vmax.f32 %v433_v62, 0.0 }
 0x12f   : > { %v541_v11 = vmax.f32 %v508_v3, 0.0  ;;  %v439_v12 = vadd.f32 %v438_v9, %v1856_v31  ;;  %v512_v13 = vadd.f32 %v511_v10, %v1858_v32  ;;  %v539_v17 = vmax.f32 %v435_v2, 0.0  ;;  %v1895_v31 = vld.sshfl [vmem:[%s1987_s5] sm:$0x11 pattern:$0x75316420] }
 0x130   : > { %v542_v15 = vmax.f32 %v437_v7, 0.0  ;;  %v544_v16 = vmax.f32 %v510_v8, 0.0  ;;  %v1673_v30 = vmov 1966171168   ;;  %v1147_v26 = vcombine.high %v1895_v31, %v1895_v31 }
 0x131   : > { %v543_v18 = vmax.f32 %v439_v12, 0.0  ;;  %v545_v19 = vmax.f32 %v512_v13, 0.0  ;;  %v1149_v25 = vunpack.c.l.s4 %v1673_v30 }
 0x132   : > { %v558_v20 = vpack.c.bf16 %v542_v15, %v538_v14  ;;  %v560_v21 = vpack.c.bf16 %v544_v16, %v540_v6 }
 0x133   : > { %v559_v29 = vpack.c.bf16 %v543_v18, %v539_v17  ;;  %v561_v22 = vpack.c.bf16 %v545_v19, %v541_v11  ;;  %v1150_v32 = vunpack.c.0.s8 %v1149_v25 }
 0x135   : > { %1020 = vmatprep.mubr.bf16.mxu1 %v559_v29  ;;  %1093 = vmatprep.mubr.bf16.mxu0 %v561_v22  ;;  %v1900_v28 = vsub.s32 %v1150_v32, %v1838_v23 }
 0x136   : > { %1021 = vmatmul.mubr.bf16.gmra.mrb[28].mxu1 %v558_v20  ;;  %1094 = vmatmul.mubr.bf16.gmra.mrb[28].mxu0 %v560_v21 }
 0x137   : > { %v1154_v33 = vrot.slane %v1895_v31, %v1900_v28  ;;  %v1161_v34 = vrot.slane %v1147_v26, %v1900_v28 }
 0x139   : > { %1196 = vmatprep.mubr.bf16.mxu1 %v1161_v34 }
 0x1f1   : > { %v992_v39 = vpop.f32.mrb[16].mxu1  ;;  %v1065_v40 = vpop.f32.mrb[16].mxu0 }
 0x1f2   : > { %v993_v41 = vadd.f32 %v992_v39, %v1909_v37  ;;  %v994_v42 = vpop.f32.mrb[17].mxu1  ;;  %v1067_v43 = vpop.f32.mrb[17].mxu0 }
 0x1f3   : > { %v995_v44 = vadd.f32 %v994_v42, %v1913_v38  ;;  %v996_v45 = vpop.f32.mrb[18].mxu1  ;;  %v1069_v46 = vpop.f32.mrb[18].mxu0 }
 0x1f4   : > { %v1066_v47 = vadd.f32 %v1065_v40, %v993_v41  ;;  %v997_v48 = vadd.f32 %v996_v45, %v1909_v37  ;;  %v998_v49 = vpop.f32.mrb[19].mxu1  ;;  %v1071_v50 = vpop.f32.mrb[19].mxu0 }
 0x1f5   : > { %v1068_v51 = vadd.f32 %v1067_v43, %v995_v44  ;;  %v999_v23 = vadd.f32 %v998_v49, %v1913_v38 }
 0x1f6   : > { %v1070_v27 = vadd.f32 %v1069_v46, %v997_v48  ;;  %v1104_v53 = vmax.f32 %v1066_v47, 0.0 }
 0x1f7   : > { %v1072_v52 = vadd.f32 %v1071_v50, %v999_v23  ;;  %v1105_v55 = vmax.f32 %v1068_v51, 0.0 }
 0x1f8   : > { %v1106_v54 = vmax.f32 %v1070_v27, 0.0 }
 0x1f9   : > { %v1107_v56 = vmax.f32 %v1072_v52, 0.0  ;;  %v1002_v57 = vpop.f32.mrb[20].mxu1  ;;  %v1075_v58 = vpop.f32.mrb[20].mxu0 }
 0x1fa   : > { %v1121_v59 = vpack.c.bf16 %v1106_v54, %v1104_v53  ;;  %v1003_v60 = vadd.f32 %v1002_v57, %v1909_v37  ;;  %v1004_v61 = vpop.f32.mrb[21].mxu1  ;;  %v1077_v62 = vpop.f32.mrb[21].mxu0 }
 0x1fb   : > { %v1122_v63 = vpack.c.bf16 %v1107_v56, %v1105_v55  ;;  %v1005_v0 = vadd.f32 %v1004_v61, %v1913_v38  ;;  %v1006_v1 = vpop.f32.mrb[22].mxu1  ;;  %v1079_v2 = vpop.f32.mrb[22].mxu0 }
 0x1fc   : > { %v1076_v3 = vadd.f32 %v1075_v58, %v1003_v60  ;;  %v1007_v4 = vadd.f32 %v1006_v1, %v1909_v37  ;;  %v1008_v5 = vpop.f32.mrb[23].mxu1  ;;  %v1081_v6 = vpop.f32.mrb[23].mxu0 }
 0x1fd   : > { %v1078_v7 = vadd.f32 %v1077_v62, %v1005_v0  ;;  %v1009_v8 = vadd.f32 %v1008_v5, %v1913_v38  ;;  %1164 = vmatprep.subr.bf16.mxu1 %v1122_v63 }
 0x1fe   : > { %v1080_v9 = vadd.f32 %v1079_v2, %v1007_v4  ;;  %1165 = vmatpush1.bf16.xpose.msra.mxu1 %v1121_v59  ;;  %v1108_v11 = vmax.f32 %v1076_v3, 0.0 }
 0x1ff   : > { %v1082_v10 = vadd.f32 %v1081_v6, %v1009_v8  ;;  %v1109_v13 = vmax.f32 %v1078_v7, 0.0 }
 0x200   : > { %v1110_v12 = vmax.f32 %v1080_v9, 0.0 }
 0x201   : > { %v1111_v14 = vmax.f32 %v1082_v10, 0.0  ;;  %v1012_v15 = vpop.f32.mrb[24].mxu1  ;;  %v1085_v16 = vpop.f32.mrb[24].mxu0 }
 0x202   : > { %v1123_v17 = vpack.c.bf16 %v1110_v12, %v1108_v11  ;;  %v1013_v18 = vadd.f32 %v1012_v15, %v1909_v37  ;;  %v1014_v19 = vpop.f32.mrb[25].mxu1  ;;  %v1087_v20 = vpop.f32.mrb[25].mxu0 }
 0x203   : > { %v1124_v21 = vpack.c.bf16 %v1111_v14, %v1109_v13  ;;  %v1015_v29 = vadd.f32 %v1014_v19, %v1913_v38  ;;  %v1016_v22 = vpop.f32.mrb[26].mxu1  ;;  %v1089_v30 = vpop.f32.mrb[26].mxu0 }
 0x204   : > { %v1086_v25 = vadd.f32 %v1085_v16, %v1013_v18  ;;  %v1017_v32 = vadd.f32 %v1016_v22, %v1909_v37  ;;  %v1018_v26 = vpop.f32.mrb[27].mxu1  ;;  %v1091_v34 = vpop.f32.mrb[27].mxu0 }
 0x205   : > { %v1088_v35 = vadd.f32 %v1087_v20, %v1015_v29  ;;  %v1019_v36 = vadd.f32 %v1018_v26, %v1913_v38  ;;  %1166 = vmatprep.subr.bf16.mxu1 %v1124_v21 }
 0x206   : > { %v1090_v39 = vadd.f32 %v1089_v30, %v1017_v32  ;;  %1167 = vmatpush1.bf16.xpose.msra.mxu1 %v1123_v17  ;;  %v1112_v41 = vmax.f32 %v1086_v25, 0.0 }
 0x207   : > { %v1092_v40 = vadd.f32 %v1091_v34, %v1019_v36  ;;  %v1113_v43 = vmax.f32 %v1088_v35, 0.0 }
 0x208   : > { %v1114_v42 = vmax.f32 %v1090_v39, 0.0 }
 0x209   : > { %v1115_v44 = vmax.f32 %v1092_v40, 0.0  ;;  %v1022_v45 = vpop.f32.mrb[28].mxu1  ;;  %v1095_v46 = vpop.f32.mrb[28].mxu0 }
 0x20a   : > { %v1125_v47 = vpack.c.bf16 %v1114_v42, %v1112_v41  ;;  %v1023_v48 = vadd.f32 %v1022_v45, %v1909_v37  ;;  %v1024_v49 = vpop.f32.mrb[29].mxu1  ;;  %v1097_v50 = vpop.f32.mrb[29].mxu0 }
 0x20b   : > { %v1126_v51 = vpack.c.bf16 %v1115_v44, %v1113_v43  ;;  %v1025_v23 = vadd.f32 %v1024_v49, %v1913_v38  ;;  %v1026_v27 = vpop.f32.mrb[30].mxu1  ;;  %v1099_v52 = vpop.f32.mrb[30].mxu0 }
 0x20c   : > { %v1096_v53 = vadd.f32 %v1095_v46, %v1023_v48  ;;  %v1027_v54 = vadd.f32 %v1026_v27, %v1909_v37  ;;  %v1028_v55 = vpop.f32.mrb[31].mxu1  ;;  %v1101_v56 = vpop.f32.mrb[31].mxu0 }
 0x20d   : > { %v1098_v57 = vadd.f32 %v1097_v50, %v1025_v23  ;;  %v1029_v58 = vadd.f32 %v1028_v55, %v1913_v38  ;;  %1168 = vmatprep.subr.bf16.mxu1 %v1126_v51  ;;  %v1133_v37 = vpop.permute.xlu0 %1132 }
 0x20e   : > { %v1100_v59 = vadd.f32 %v1099_v52, %v1027_v54  ;;  %1169 = vmatpush1.bf16.xpose.msra.mxu1 %v1125_v47  ;;  %v1116_v61 = vmax.f32 %v1096_v53, 0.0  ;;  %v1138_v38 = vrot.slane %v1133_v37, %v1841_v24 }
 0x20f   : > { %v1102_v60 = vadd.f32 %v1101_v56, %v1029_v58  ;;  %v1117_v63 = vmax.f32 %v1098_v57, 0.0 }
 0x210   : > { %v1118_v62 = vmax.f32 %v1100_v59, 0.0 }
 0x211   : > { %v1119_v0 = vmax.f32 %v1102_v60, 0.0 }
 0x212   : > { %v1127_v1 = vpack.c.bf16 %v1118_v62, %v1116_v61 }
 0x213   : > { %v1128_v2 = vpack.c.bf16 %v1119_v0, %v1117_v63 }
 0x215   : > { %1170 = vmatprep.subr.bf16.mxu1 %v1128_v2 }
 0x216   : > { %1171 = vmatpush1.bf16.xpose.msra.mxu1 %v1127_v1 }
 0x21d   : > { %1197 = vmatmul.mubr.bf16.vlgmr.msra.gmra.mrb[32].mxu1 %v1154_v33 }
 0x2f0   : > { %v1198_v3 = vpop.f32.mrb[32].mxu1 }
 0x2f1   : > { %v1199_v4 = vadd.f32 %v1198_v3, %v1138_v38  ;;  %v1200_v5 = vpop.f32.mrb[33].mxu1 }
 0x2f2   : > { %v1201_v6 = vpop.f32.mrb[34].mxu1 }
 0x2f3   : > { %v1204_v7 = vsub.f32 0.0, %v1199_v4  ;;  %v1202_v8 = vpop.f32.mrb[35].mxu1 }
 0x2f5   : > { %v1205_v9 = vmul.f32 1.442695, %v1204_v7 }
 0x2f7   : > { %1569 = vpow2.f32 %v1205_v9 }
 0x301   : > { %v1570_v10 = vpop.eup %1569 }
 0x302   : > { %v1207_v11 = vadd.f32 1.0, %v1570_v10 }
 0x304   : > { %1571 = vrcp.f32 %v1207_v11 }
 0x30e   : > { %v1572_v24 = vpop.eup %1571 }
 0x30f   : > { %1211 = vst.msk [vmem:[%s288_s14] sm:$0x1] %vm1210_vm2, %v1572_v24 }
 0x310   : > { %1614 = shalt.err (!%p1611_p7)
}
 0x311   : > { %s1615_s30 = scalar_lea.hbm %s1940_s21, 16  ;;  %s1619_s15 = scalar_lea.hbm %s1989_s7, 32 }
 0x312   : > { %p1616_p8 = scmp.ne.s32.totalorder %s1940_s21, %s1615_s30  ;;  %p1620_p1 = scmp.lt.u32.totalorder %s1940_s21, %s1989_s7 }
 0x313   : > { %p1621_p0 = scmp.lt.u32.totalorder %s1619_s15, %s1615_s30  ;;  %p1623_p6 = scmp.lt.u32.totalorder %s1615_s30, %s1940_s21 }
 0x314   : > { %p1617_p11 = pnand %p1616_p8, %p2000_p9 }
 0x315   : > { %p1622_p5 = por %p1621_p0, %p1620_p1 }
 0x316   : > { %p1618_p13 = pneg %p1617_p11 }
 0x317   : > { %p1624_p10 = por %p1623_p6, %p1622_p5 }
 0x319   : > { %p1625_p12 = pnand %p1624_p10, %p1618_p13 }
 0x31b   : > { %1628 = shalt.err (!%p1625_p12)
}
 0x31c   : > { %1418 = dma.vmem_to_hbm [thread:$0]  (%p2000_p9), %s1942_s17, 16, %s1940_s21, %s1213_s22  }
 0x31d PF: > { %p1430_p2 = scmp.ge.s32.totalorder %s1667_s29, 2  ;;  %s1237_s14 = sand.u32 1, %s1655_s26  }
 0x31e   : > { %p2001_p3 = scmp.ne.s32.totalorder %s1994_s13, 0  ;;  %s1238_s19 = scalar_lea.sflag [#allocation5], %s1237_s14 }
 0x320   : > { %p1425_p4 = pnand %p1430_p2, %p2001_p3 }
 0x322   : > { %1650 = dma.done.wait (!%p1425_p4), %s1238_s19, 16  }
 0x323   : > { %1652 = vsyncadd (!%p1425_p4), %s1238_s19, 4294967280  ;;  %p20_p7 = scmp.ge.s32.totalorder %s1743_s8, 4   ;;  %s2002_s26 = smov %s1659_s27 }
 0x324   : > { %s2003_s27 = smov %s1663_s28  ;;  %s2004_s28 = smov %s1754_s11 }
 0x325   : > { %s2005_s29 = smov %s1743_s8  ;;  %22 = sbr.rel (!%p20_p7) target bundleno = 7 (0x7), region = 88 }
 0x32c   :  { %1242 = vsyncpa [#allocation4], 1 }
 0x32d   :  { %1244 = vsyncpa [#allocation4 + $0x1], 1 }
 0x32e   :  { %1245 = vsyncpa [#allocation5], 1 }
 0x32f   :  { %1247 = vsyncpa [#allocation5 + $0x1], 1 }

</bundles_post_ra>
